<compile_context>
chip_gen: v7x
topology: tpu7x:2x2x1
jax: 0.10.0
libtpu: 0.0.40
codegen_flags: <defaults>
</compile_context>

<pallas_src>
import math

import jax
import jax.numpy as jnp
from jax.experimental import pallas as pl
from jax.experimental.pallas import tpu as pltpu


def _round_up(x, m):
    return ((x + m - 1) // m) * m


def _time_embedding_kernel(t_ref, freq_ref, phase_ref, o_ref):
    # t_ref:     (TB, 1)      f32 timesteps (row tile)
    # freq_ref:  (1, OUT_W)   f32 [emb | emb | 0-pad]   (grid-invariant)
    # phase_ref: (1, OUT_W)   f32 [0   | pi/2| 0-pad]   (grid-invariant)
    # o_ref:     (TB, OUT_W)  f32 -> single lane-dense unmasked store
    o_ref[...] = jnp.sin(t_ref[...] * freq_ref[...] + phase_ref[...])


def make_time_embedding_buffer(dim):
    """Deterministic buffer construction, matching TimeEmbedding.__init__."""
    half_dim = dim // 2
    assert dim % 2 == 0 and half_dim >= 2, "dim must be even and >= 4"
    scale = math.log(10000.0) / (half_dim - 1)
    return jnp.exp(jnp.arange(half_dim, dtype=jnp.float32) * -scale)


def make_time_embedding_tables(emb):
    """Build the padded (1, out_w) freq / phase tables ONCE (hoisted out of the
    per-call path).  Layout is [sin-half | cos-half | zero pad] via
    cos(x) = sin(x + pi/2)."""
    emb = emb.astype(jnp.float32)
    half_dim = emb.shape[0]
    dim = 2 * half_dim
    out_w = _round_up(dim, 128)
    freq = jnp.zeros((1, out_w), jnp.float32)
    freq = freq.at[0, :half_dim].set(emb).at[0, half_dim:dim].set(emb)
    phase = jnp.zeros((1, out_w), jnp.float32)
    phase = phase.at[0, half_dim:dim].set(jnp.float32(math.pi / 2.0))
    return freq, phase, dim


def time_embedding(inputs, freq_table, phase_table, dim, *, block_rows=1024):
    """inputs: (B,) any float/int dtype. freq_table/phase_table: (1, out_w)
    from make_time_embedding_tables. Returns (B, dim) float32 = [sin | cos],
    exactly like the PyTorch module's forward."""
    inputs = inputs.astype(jnp.float32)
    B = inputs.shape[0]
    out_w = freq_table.shape[-1]

    # Row tile: multiple of 8 sublanes, as large as block_rows / B allow,
    # capped so the double-buffered f32 output tile stays well inside scoped
    # VMEM (v7x: 32 MiB default scoped / 64 MiB physical).
    tb = min(_round_up(block_rows, 8), _round_up(B, 8))
    vmem_budget = 16 * 1024 * 1024
    while tb > 8 and 2 * tb * out_w * 4 > vmem_budget:
        tb = max(8, _round_up(tb // 2, 8))
    # v7x megacore: ensure >= 2 parallel grid steps when B is large enough to
    # make the split worthwhile (harmless on single-TC v5e/v6e).
    if B >= 512 and _round_up(B, tb) // tb == 1:
        tb = max(8, _round_up(tb // 2, 8))

    b_pad = _round_up(B, tb)
    grid = (b_pad // tb,)

    t2d = inputs.reshape(B, 1)
    if b_pad != B:
        t2d = jnp.pad(t2d, ((0, b_pad - B), (0, 0)))

    out = pl.pallas_call(
        _time_embedding_kernel,
        out_shape=jax.ShapeDtypeStruct((b_pad, out_w), jnp.float32),
        grid=grid,
        in_specs=[
            pl.BlockSpec((tb, 1), lambda i: (i, 0)),        # timesteps tile
            pl.BlockSpec((1, out_w), lambda i: (0, 0)),     # freq (grid-invariant)
            pl.BlockSpec((1, out_w), lambda i: (0, 0)),     # phase (grid-invariant)
        ],
        out_specs=pl.BlockSpec((tb, out_w), lambda i: (i, 0)),
        compiler_params=pltpu.CompilerParams(
            dimension_semantics=("parallel",)),
    )(t2d, freq_table, phase_table)

    if b_pad == B and out_w == dim:
        return out
    return out[:B, :dim]


def reference_time_embedding(inputs, emb):
    """Pure-JAX mirror of the PyTorch forward (sin/cos concat)."""
    inputs = inputs.astype(jnp.float32)
    x = inputs[:, None] * emb[None, :].astype(jnp.float32)
    return jnp.concatenate([jnp.sin(x), jnp.cos(x)], axis=-1)


if __name__ == "__main__":
    key = jax.random.PRNGKey(0)

    # Case 1: lane-aligned path (dim = 256 -> out_w == dim), B multiple of 8.
    dim1, B1 = 256, 8
    t1 = jax.random.randint(key, (B1,), 0, 1000).astype(jnp.float32)
    emb1 = make_time_embedding_buffer(dim1)
    freq1, phase1, d1 = make_time_embedding_tables(emb1)
    out1 = jax.block_until_ready(time_embedding(t1, freq1, phase1, d1))
    ref1 = reference_time_embedding(t1, emb1)
    assert out1.shape == (B1, dim1)
    assert jnp.allclose(out1, ref1, atol=1e-4, rtol=1e-5), "mismatch (dim=256)"

    # Case 2: non-aligned shapes (dim = 64, B = 20) exercising the lane- and
    # row-padding path (output is sliced, never repacked).
    dim2, B2 = 64, 20
    t2 = jax.random.randint(jax.random.fold_in(key, 1), (B2,), 0, 1000)
    t2 = t2.astype(jnp.float32)
    emb2 = make_time_embedding_buffer(dim2)
    freq2, phase2, d2 = make_time_embedding_tables(emb2)
    out2 = jax.block_until_ready(time_embedding(t2, freq2, phase2, d2))
    ref2 = reference_time_embedding(t2, emb2)
    assert out2.shape == (B2, dim2)
    assert jnp.allclose(out2, ref2, atol=1e-4, rtol=1e-5), "mismatch (dim=64)"

    print("KERNEL_OK")
</pallas_src>

<mosaic_0001>
module attributes {stable_mosaic.version = 11 : i64} {
  func.func @_time_embedding_kernel(%arg0: i32, %arg1: memref<8x1xf32, #tpu.memory_space<vmem>>, %arg2: memref<1x256xf32, #tpu.memory_space<vmem>>, %arg3: memref<1x256xf32, #tpu.memory_space<vmem>>, %arg4: memref<8x256xf32, #tpu.memory_space<vmem>>) attributes {dimension_semantics = [#tpu.dimension_semantics<parallel>], iteration_bounds = array<i64: 1>, scalar_prefetch = 0 : i64, scratch_operands = 0 : i64, tpu.core_type = #tpu.core_type<tc>, window_params = [{transform_indices = @transform_0, window_bounds = array<i64: 8, 1>}, {pipeline_mode = #tpu.pipeline_mode<synchronous>, transform_indices = @transform_1, window_bounds = array<i64: 1, 256>}, {pipeline_mode = #tpu.pipeline_mode<synchronous>, transform_indices = @transform_2, window_bounds = array<i64: 1, 256>}, {transform_indices = @transform_3, window_bounds = array<i64: 8, 256>}]} {
    %c0 = arith.constant 0 : index
    %c0_0 = arith.constant 0 : index
    %0 = vector.load %arg1[%c0, %c0_0] : memref<8x1xf32, #tpu.memory_space<vmem>>, vector<8x1xf32>
    %c0_1 = arith.constant 0 : index
    %c0_2 = arith.constant 0 : index
    %1 = vector.load %arg2[%c0_1, %c0_2] : memref<1x256xf32, #tpu.memory_space<vmem>>, vector<1x256xf32>
    %2 = vector.broadcast %0 : vector<8x1xf32> to vector<8x256xf32>
    %3 = vector.broadcast %1 : vector<1x256xf32> to vector<8x256xf32>
    %4 = arith.mulf %2, %3 : vector<8x256xf32>
    %c0_3 = arith.constant 0 : index
    %c0_4 = arith.constant 0 : index
    %5 = vector.load %arg3[%c0_3, %c0_4] : memref<1x256xf32, #tpu.memory_space<vmem>>, vector<1x256xf32>
    %6 = vector.broadcast %5 : vector<1x256xf32> to vector<8x256xf32>
    %7 = arith.addf %4, %6 : vector<8x256xf32>
    %8 = math.sin %7 : vector<8x256xf32>
    %c0_5 = arith.constant 0 : index
    %c0_6 = arith.constant 0 : index
    %9 = vector.load %arg4[%c0_5, %c0_6] : memref<8x256xf32, #tpu.memory_space<vmem>>, vector<8x256xf32>
    tpu.vector_store %arg4[%c0_5, %c0_6], %8 {strides = array<i32>} : memref<8x256xf32, #tpu.memory_space<vmem>>, vector<8x256xf32>,
    return
  }
  func.func @transform_0(%arg0: i32) -> (i32, i32) {
    %c0_i32 = arith.constant 0 : i32
    %c0_i32_0 = arith.constant 0 : i32
    return %arg0, %c0_i32 : i32, i32
  }
  func.func @transform_1(%arg0: i32) -> (i32, i32) {
    %c0_i32 = arith.constant 0 : i32
    %c0_i32_0 = arith.constant 0 : i32
    %c0_i32_1 = arith.constant 0 : i32
    return %c0_i32, %c0_i32_0 : i32, i32
  }
  func.func @transform_2(%arg0: i32) -> (i32, i32) {
    %c0_i32 = arith.constant 0 : i32
    %c0_i32_0 = arith.constant 0 : i32
    %c0_i32_1 = arith.constant 0 : i32
    return %c0_i32, %c0_i32_0 : i32, i32
  }
  func.func @transform_3(%arg0: i32) -> (i32, i32) {
    %c0_i32 = arith.constant 0 : i32
    %c0_i32_0 = arith.constant 0 : i32
    return %arg0, %c0_i32 : i32, i32
  }
}

</mosaic_0001>

<bundles_post_ra>
// kernel: tpu_custom_call.1
= control target key start
LH: loop header
LB: loop body
LE: loop exit
PB: predicated region body
PF: predicated region fallthrough
CT: control target
= control target key end

     0   :  { %v330_v1 = vmov 0   ;;  %s441_s0 = inlined_call_operand.vmem [shape: f32[8,1], index: 0, kind: input, shape index: {}]   ;;  %s442_s1 = inlined_call_operand.vmem [shape: f32[1,256], index: 1, kind: input, shape index: {}]   ;;  %s443_s2 = inlined_call_operand.vmem [shape: f32[1,256], index: 2, kind: input, shape index: {}]   ;;  %s444_s3 = inlined_call_operand.hbm [shape: f32[8,256], index: 3, kind: output, shape index: {}]  }
   0x1   :  { %v15_v0 = vld [vmem:[%s441_s0] sm:$0xff]  ;;  %297 = vset.pattern.permute.xlu0 %v330_v1 }
   0x2   :  { %19 = vperm.xlu0 %297, %v15_v0  }
   0x3   :  { %8 = vsyncpa [#allocation3], 0  ;;  %v23_v2 = vlaneseq  ;;  %v16_v6 = vld [vmem:[%s442_s1] sm:$0x3]  ;;  %v331_v37 = vmov 683565275  }
   0x4   :  { %v35_v7 = vld [vmem:[%s443_s2] sm:$0x3]  ;;  %v332_v41 = vmov 2475754826   ;;  %v333_v43 = vmov 2131351028  }
   0x5   :  { %v24_v3 = vshrl.u32 %v23_v2, 7  ;;  %v334_v45 = vmov 2102212464   ;;  %v335_v47 = vmov 920167782   ;;  %s337_s0 = smov [#allocation2]  }
   0x6   :  { %v336_v54 = vmov 1326507024   ;;  %s265_s1 = sshll.u32 %s337_s0, 4  ;;  %s266_s1 = int_to_ptr.vmem [resolvable:$true] %s265_s1 }
   0x7   :  { %v25_v4 = vsub.s32 0, %v24_v3  ;;  %v29_v5 = vsub.s32 1, %v24_v3  ;;  %s306_s2 = scalar_lea.vmem %s266_s1, 256  ;;  %p311_p1 = scmp.lt.s32.totalorder %s266_s1, %s266_s1 }
   0x8   :  { %p307_p0 = scmp.ne.s32.totalorder %s266_s1, %s306_s2  ;;  %p312_p2 = scmp.lt.s32.totalorder %s306_s2, %s306_s2 }
   0x9   :  { %v26_v8 = vrot.slane %v16_v6, %v25_v4  ;;  %v30_v9 = vrot.slane %v16_v6, %v29_v5  ;;  %v40_v10 = vrot.slane %v35_v7, %v25_v4  ;;  %v44_v11 = vrot.slane %v35_v7, %v29_v5 }
   0xa   :  { %p313_p3 = por %p312_p2, %p311_p1 }
   0xc   :  { %p314_p4 = pnand %p313_p3, %p307_p0 }
  0x81   :  { %v20_v12 = vpop.permute.xlu0 %19 }
  0x82   :  { %v33_v13 = vmul.f32 %v26_v8, %v20_v12  ;;  %v34_v14 = vmul.f32 %v30_v9, %v20_v12 }
  0x84   :  { %v367_v15 = vadd.f32 %v40_v10, %v33_v13  ;;  %v369_v16 = vadd.f32 %v44_v11, %v34_v14 }
  0x86   :  { %v49_v17 = vand.u32 2147483647, %v367_v15  ;;  %v52_v18 = vand.u32 2139095040, %v367_v15  ;;  %v156_v19 = vand.u32 2139095040, %v369_v16  ;;  %v153_v22 = vand.u32 2147483647, %v369_v16 }
  0x87   :  { %vm51_vm14 = vcmp.lt.s32.totalorder %v367_v15, 0 }
  0x88   :  { %v53_v20 = vshrl.u32 %v52_v18, 23  ;;  %v56_v21 = vand.u32 8388607, %v49_v17  ;;  %v157_v23 = vshrl.u32 %v156_v19, 23  ;;  %v379_v28 = vand.u32 8388607, %v153_v22 }
  0x89   :  { %vm50_vm15 = vcmp.le.f32.partialorder %v49_v17, 0.7853982 }
  0x8a   :  { %v273_v24 = vadd.s32 4294967169, %v53_v20  ;;  %v277_v25 = vadd.s32 4294967169, %v157_v23  ;;  %v57_v27 = vor.u32 8388608, %v56_v21  ;;  %v161_v35 = vor.u32 8388608, %v379_v28 }
  0x8c   :  { %v59_v26 = vadd.s32 1, %v273_v24  ;;  %v163_v29 = vadd.s32 1, %v277_v25  ;;  %v381_v34 = vshll.u32 %v57_v27, 8 }
  0x8e   :  { %vm60_vm0 = vcmp.gt.s32.totalorder %v59_v26, 0  ;;  %vm164_vm1 = vcmp.gt.s32.totalorder %v163_v29, 0 }
  0x8f   :  { %v61_v30 = vsel %vm60_vm0, %v59_v26, 0  ;;  %v165_v33 = vsel %vm164_vm1, %v163_v29, 0  ;;  %v201_v29 = vshll.u32 %v161_v35, 8  ;;  %vm155_vm0 = vcmp.lt.s32.totalorder %v369_v16, 0 }
  0x90   :  { %v62_v31 = vshrl.u32 %v61_v30, 5  ;;  %v63_v32 = vand.u32 31, %v61_v30  ;;  %v384_v39 = vshrl.u32 %v165_v33, 5  ;;  %v167_v40 = vand.u32 31, %v165_v33 }
  0x91   :  { %vm154_vm1 = vcmp.le.f32.partialorder %v153_v22, 0.7853982 }
  0x92   :  { %v64_v36 = vsub.s32 32, %v63_v32  ;;  %v66_v38 = vshll.u32 %v331_v37, %v63_v32  ;;  %v69_v42 = vshll.u32 %v332_v41, %v63_v32  ;;  %v72_v44 = vshll.u32 %v333_v43, %v63_v32 }
  0x93   :  { %v75_v46 = vshll.u32 %v334_v45, %v63_v32  ;;  %v78_v48 = vshll.u32 %v335_v47, %v63_v32  ;;  %vm81_vm2 = vcmp.lt.s32.totalorder %v62_v31, 1  ;;  %vm82_vm3 = vcmp.lt.s32.totalorder %v62_v31, 2 }
  0x94   :  { %v67_v49 = vshrl.u32 %v332_v41, %v64_v36  ;;  %v70_v50 = vshrl.u32 %v333_v43, %v64_v36  ;;  %v73_v51 = vshrl.u32 %v334_v45, %v64_v36  ;;  %v65_v52 = vshrl.u32 %v331_v37, %v64_v36 }
  0x95   :  { %v76_v53 = vshrl.u32 %v335_v47, %v64_v36  ;;  %v79_v55 = vshrl.u32 %v336_v54, %v64_v36  ;;  %v168_v59 = vsub.s32 32, %v167_v40  ;;  %vm83_vm4 = vcmp.lt.s32.totalorder %v62_v31, 3 }
  0x96   :  { %v68_v56 = vor.u32 %v67_v49, %v66_v38  ;;  %v71_v57 = vor.u32 %v70_v50, %v69_v42  ;;  %v74_v58 = vor.u32 %v73_v51, %v72_v44  ;;  %vm84_vm5 = vcmp.lt.s32.totalorder %v62_v31, 4 }
  0x97   :  { %v77_v60 = vor.u32 %v76_v53, %v75_v46  ;;  %v80_v61 = vor.u32 %v79_v55, %v78_v48  ;;  %v170_v5 = vshll.u32 %v331_v37, %v167_v40  ;;  %v171_v8 = vshrl.u32 %v332_v41, %v168_v59 }
  0x98   :  { %v85_v62 = vsel %vm81_vm2, %v65_v52, %v68_v56  ;;  %v86_v63 = vsel %vm84_vm5, %v74_v58, 2102212464  ;;  %v89_v0 = vsel %vm81_vm2, %v68_v56, %v71_v57  ;;  %v93_v1 = vsel %vm81_vm2, %v71_v57, %v74_v58 }
  0x99   :  { %v87_v2 = vsel %vm83_vm4, %v71_v57, %v86_v63  ;;  %v90_v3 = vsel %vm84_vm5, %v77_v60, 920167782  ;;  %v94_v4 = vsel %vm84_vm5, %v80_v61, 1326507024  ;;  %v173_v9 = vshll.u32 %v332_v41, %v167_v40 }
  0x9a   :  { %v91_v6 = vsel %vm83_vm4, %v74_v58, %v90_v3  ;;  %v95_v7 = vsel %vm83_vm4, %v77_v60, %v94_v4  ;;  %v88_v10 = vsel %vm82_vm3, %v85_v62, %v87_v2  ;;  %v174_v13 = vshrl.u32 %v333_v43, %v168_v59 }
  0x9b   :  { %v92_v11 = vsel %vm82_vm3, %v89_v0, %v91_v6  ;;  %v96_v12 = vsel %vm82_vm3, %v93_v1, %v95_v7  ;;  %v172_v21 = vor.u32 %v171_v8, %v170_v5  ;;  %v176_v24 = vshll.u32 %v333_v43, %v167_v40 }
  0x9c   :  { %v393_v14 = vmul.u32.u64.low %v381_v34, %v96_v12  ;;  %v394_v18 = vmul.u32.u64.high %v381_v34, %v96_v12, %v393_v14  ;;  %v397_v19 = vmul.u32.u64.low %v381_v34, %v92_v11  ;;  %v398_v20 = vmul.u32.u64.high %v381_v34, %v92_v11, %v397_v19 }
  0x9d   :  { %v175_v23 = vor.u32 %v174_v13, %v173_v9  ;;  %v177_v25 = vshrl.u32 %v334_v45, %v168_v59  ;;  %v179_v26 = vshll.u32 %v334_v45, %v167_v40  ;;  %v180_v27 = vshrl.u32 %v335_v47, %v168_v59 }
  0x9e   :  { %v183_v28 = vshrl.u32 %v336_v54, %v168_v59  ;;  %v104_v30 = vmul.u32 %v381_v34, %v88_v10  ;;  %v169_v31 = vshrl.u32 %v331_v37, %v168_v59  ;;  %v182_v33 = vshll.u32 %v335_v47, %v167_v40 }
  0x9f   :  { %v178_v32 = vor.u32 %v177_v25, %v176_v24  ;;  %vm106_vm6 = vc.u32 %v394_v18, %v397_v19  ;;  %v107_v36 = vadd.s32 1, %v398_v20  ;;  %v181_v38 = vor.u32 %v180_v27, %v179_v26 }
  0xa0   :  { %vm185_vm7 = vcmp.lt.s32.totalorder %v384_v39, 1  ;;  %v184_v41 = vor.u32 %v183_v28, %v182_v33  ;;  %vm187_vm8 = vcmp.lt.s32.totalorder %v384_v39, 3  ;;  %vm188_vm9 = vcmp.lt.s32.totalorder %v384_v39, 4 }
  0xa1   :  { %v193_v42 = vsel %vm185_vm7, %v172_v21, %v175_v23  ;;  %v108_v35 = vsel %vm106_vm6, %v107_v36, %v398_v20  ;;  %v190_v43 = vsel %vm188_vm9, %v178_v32, 2102212464  ;;  %v194_v34 = vsel %vm188_vm9, %v181_v38, 920167782 }
  0xa2   :  { %v197_v37 = vsel %vm185_vm7, %v175_v23, %v178_v32  ;;  %v109_v44 = vadd.s32 %v108_v35, %v104_v30  ;;  %vm186_vm10 = vcmp.lt.s32.totalorder %v384_v39, 2  ;;  %v195_v40 = vsel %vm187_vm8, %v178_v32, %v194_v34 }
  0xa3   :  { %v198_v45 = vsel %vm188_vm9, %v184_v41, 1326507024  ;;  %v189_v46 = vsel %vm185_vm7, %v169_v31, %v172_v21  ;;  %v191_v47 = vsel %vm187_vm8, %v175_v23, %v190_v43  ;;  %v196_v48 = vsel %vm186_vm10, %v193_v42, %v195_v40 }
  0xa4   :  { %v199_v49 = vsel %vm187_vm8, %v181_v38, %v198_v45  ;;  %v110_v50 = vadd.s32 536870912, %v109_v44  ;;  %v408_v52 = vmul.u32.u64.low %v201_v29, %v196_v48  ;;  %v409_v53 = vmul.u32.u64.high %v201_v29, %v196_v48, %v408_v52 }
  0xa5   :  { %v200_v51 = vsel %vm186_vm10, %v197_v37, %v199_v49  ;;  %v192_v57 = vsel %vm186_vm10, %v189_v46, %v191_v47  ;;  %v105_v9 = vadd.s32 %v397_v19, %v394_v18  ;;  %vm141_vm5 = vweird.f32 %v367_v15 }
  0xa6   :  { %v411_v54 = vmul.u32.u64.low %v201_v29, %v200_v51  ;;  %v412_v55 = vmul.u32.u64.high %v201_v29, %v200_v51, %v411_v54  ;;  %v111_v56 = vshrl.u32 %v110_v50, 30  ;;  %v211_v59 = vadd.s32 1, %v409_v53 }
  0xa7   :  { %v208_v39 = vmul.u32 %v201_v29, %v192_v57  ;;  %vm245_vm9 = vweird.f32 %v369_v16 }
  0xa8   :  { %v112_v58 = vshll.u32 %v111_v56, 30  ;;  %vm210_vm11 = vc.u32 %v412_v55, %v408_v52  ;;  %v209_v30 = vadd.s32 %v408_v52, %v412_v55  ;;  %v135_v19 = vsub.s32 4, %v111_v56 }
  0xa9   :  { %v212_v61 = vsel %vm210_vm11, %v211_v59, %v409_v53 }
  0xaa   :  { %v113_v60 = vsub.s32 %v109_v44, %v112_v58  ;;  %v213_v62 = vadd.s32 %v212_v61, %v208_v39  ;;  %v136_v34 = vsel %vm51_vm14, %v135_v19, %v111_v56 }
  0xab   :  { %v138_v46 = vsel %vm50_vm15, 0, %v136_v34 }
  0xac   :  { %v115_v63 = vsub.s32 0, %v113_v60  ;;  %v214_v0 = vadd.s32 536870912, %v213_v62  ;;  %v142_v49 = vadd.s32 3, %v138_v46 }
  0xae   :  { %v274_v1 = vmin.u32 %v115_v63, %v113_v60  ;;  %v215_v2 = vshrl.u32 %v214_v0, 30  ;;  %v143_v52 = vand.u32 3, %v142_v49 }
  0xb0   :  { %v117_v3 = vclz %v274_v1  ;;  %v216_v4 = vshll.u32 %v215_v2, 30  ;;  %v239_v48 = vsub.s32 4, %v215_v2  ;;  %vm148_vm2 = vcmp.eq.s32.totalorder %v143_v52, 2 }
  0xb1   :  { %vm145_vm3 = vcmp.eq.s32.totalorder %v143_v52, 0  ;;  %vm144_vm4 = vcmp.lt.s32.totalorder %v143_v52, 2 }
  0xb2   :  { %v275_v5 = vadd.s32 4294967294, %v117_v3  ;;  %v217_v6 = vsub.s32 %v213_v62, %v216_v4  ;;  %v240_v17 = vsel %vm155_vm0, %v239_v48, %v215_v2 }
  0xb3   :  { %v242_v55 = vsel %vm154_vm1, 0, %v240_v17 }
  0xb4   :  { %vm276_vm12 = vcmp.lt.s32.totalorder %v275_v5, 0  ;;  %v219_v8 = vsub.s32 0, %v217_v6  ;;  %v246_v39 = vadd.s32 3, %v242_v55 }
  0xb5   :  { %v120_v7 = vsel %vm276_vm12, 0, %v275_v5 }
  0xb6   :  { %v121_v10 = vsub.s32 32, %v120_v7  ;;  %v125_v11 = vsub.s32 4294967266, %v120_v7  ;;  %v278_v12 = vmin.u32 %v219_v8, %v217_v6  ;;  %v122_v13 = vshll.u32 %v113_v60, %v120_v7 }
  0xb7   :  { %v247_v62 = vand.u32 3, %v246_v39 }
  0xb8   :  { %v123_v14 = vshrl.u32 %v105_v9, %v121_v10  ;;  %v126_v20 = vadd.s32 127, %v125_v11  ;;  %v221_v21 = vclz %v278_v12 }
  0xb9   :  { %vm252_vm6 = vcmp.eq.s32.totalorder %v247_v62, 2  ;;  %vm249_vm7 = vcmp.eq.s32.totalorder %v247_v62, 0  ;;  %vm248_vm8 = vcmp.lt.s32.totalorder %v247_v62, 2 }
  0xba   :  { %v124_v23 = vor.u32 %v123_v14, %v122_v13  ;;  %v127_v24 = vshll.u32 %v126_v20, 23  ;;  %v279_v25 = vadd.s32 4294967294, %v221_v21 }
  0xbc   :  { %v128_v26 = vor.u32 4788187, %v127_v24  ;;  %vm280_vm13 = vcmp.lt.s32.totalorder %v279_v25, 0  ;;  %v131_v28 = vcvt.s32.f32 %v124_v23 }
  0xbd   :  { %v224_v29 = vsel %vm280_vm13, 0, %v279_v25 }
  0xbe   :  { %v129_v27 = vand.u32 2147483647, %v128_v26  ;;  %v225_v31 = vsub.s32 32, %v224_v29  ;;  %v229_v32 = vsub.s32 4294967266, %v224_v29  ;;  %v226_v33 = vshll.u32 %v217_v6, %v224_v29 }
  0xc0   :  { %v132_v18 = vmul.f32 %v131_v28, %v129_v27  ;;  %v227_v36 = vshrl.u32 %v209_v30, %v225_v31  ;;  %v230_v38 = vadd.s32 127, %v229_v32 }
  0xc2   :  { %v133_v41 = vxor.u32 2147483648, %v132_v18  ;;  %v228_v42 = vor.u32 %v227_v36, %v226_v33  ;;  %v231_v35 = vshll.u32 %v230_v38, 23 }
  0xc4   :  { %v134_v43 = vsel %vm51_vm14, %v133_v41, %v132_v18  ;;  %v232_v37 = vor.u32 4788187, %v231_v35  ;;  %v235_v45 = vcvt.s32.f32 %v228_v42 }
  0xc5   :  { %v137_v44 = vsel %vm50_vm15, %v367_v15, %v134_v43 }
  0xc6   :  { %298 = vcosq.f32 %v137_v44  ;;  %v233_v40 = vand.u32 2147483647, %v232_v37 }
  0xc7   :  { %300 = vsinq.f32 %v137_v44 }
  0xc8   :  { %v236_v47 = vmul.f32 %v235_v45, %v233_v40 }
  0xca   :  { %v237_v50 = vxor.u32 2147483648, %v236_v47 }
  0xcc   :  { %v238_v51 = vsel %vm155_vm0, %v237_v50, %v236_v47 }
  0xcd   :  { %v241_v53 = vsel %vm154_vm1, %v369_v16, %v238_v51 }
  0xce   :  { %302 = vcosq.f32 %v241_v53 }
  0xcf   :  { %304 = vsinq.f32 %v241_v53 }
  0xd0   :  { %v299_v54 = vpop.eup %298 }
  0xd1   :  { %v301_v56 = vpop.eup %300  ;;  %v149_v57 = vxor.u32 2147483648, %v299_v54 }
  0xd2   :  { %v146_v58 = vxor.u32 2147483648, %v301_v56 }
  0xd3   :  { %v150_v59 = vsel %vm148_vm2, %v149_v57, %v301_v56 }
  0xd4   :  { %v147_v60 = vsel %vm145_vm3, %v299_v54, %v146_v58 }
  0xd5   :  { %v151_v22 = vsel %vm144_vm4, %v147_v60, %v150_v59 }
  0xd6   :  { %v152_v61 = vsel %vm141_vm5, nan, %v151_v22 }
  0xd7   :  { %257 = vst [vmem:[#allocation2] sm:$0xff] %v152_v61 }
  0xd8   :  { %v303_v63 = vpop.eup %302 }
  0xd9   :  { %v305_v0 = vpop.eup %304  ;;  %v253_v1 = vxor.u32 2147483648, %v303_v63 }
  0xda   :  { %v250_v2 = vxor.u32 2147483648, %v305_v0 }
  0xdb   :  { %v254_v3 = vsel %vm252_vm6, %v253_v1, %v305_v0 }
  0xdc   :  { %v251_v4 = vsel %vm249_vm7, %v303_v63, %v250_v2 }
  0xdd   :  { %v255_v5 = vsel %vm248_vm8, %v251_v4, %v254_v3 }
  0xde   :  { %v256_v15 = vsel %vm245_vm9, nan, %v255_v5 }
  0xdf   :  { %258 = vst [vmem:[#allocation2 + $0x8] sm:$0xff] %v256_v15 }
  0xe0   :  { %317 = shalt.err (!%p314_p4)
}
  0xe1   :  { %s318_s20 = scalar_lea.hbm %s444_s3, 256 }
  0xe2   :  { %p319_p5 = scmp.ne.s32.totalorder %s444_s3, %s318_s20  ;;  %p322_p6 = scmp.lt.u32.totalorder %s318_s20, %s444_s3 }
  0xe4   :  { %p324_p7 = pnand %p322_p6, %p319_p5 }
  0xe6   :  { %327 = shalt.err (!%p324_p7)
}
  0xe7   :  { %268 = dma.vmem_to_hbm [thread:$0]  %s266_s1, 256, %s444_s3, [#allocation3]  }
  0xe8   :  { %328 = dma.done.wait [#allocation3], 256  }
  0xe9   :  { %329 = vsyncadd [#allocation3], 4294967040 }
  0xea   :  { %272 = vsyncpa [#allocation3], 1 }

</bundles_post_ra>
